<compile_context>
chip_gen: v6e
topology: v6e:2x2x1
jax: 0.10.0
libtpu: 0.0.40
codegen_flags: <defaults>
</compile_context>

<pallas_src>
import jax
import jax.numpy as jnp
from jax.experimental import pallas as pl
from jax.experimental.pallas import tpu as pltpu

NEG_SLOPE = 0.01   # PyTorch nn.LeakyReLU default
_MAX_BN = 16       # cap on statically-unrolled batch block inside the kernel


def _leaky_relu(x):
    # max form: 2 VPU ops (mul + max) vs cmp+mul+select; valid for slope in [0,1].
    return jnp.maximum(x, NEG_SLOPE * x)


def _rup(x, m):
    return ((x + m - 1) // m) * m


def conv1x1_mlp_kernel(x_ref, w1_ref, b1_ref, w2_ref, b2_ref, w3_ref, b3_ref,
                       o_ref):
    # x_ref: (Bn, Cin, t_hw)   w*: (Cout, Cin)   b*: (Cout, 1)
    # o_ref: (Bn, Cout, t_hw)
    w1 = w1_ref[...]
    w2 = w2_ref[...]
    w3 = w3_ref[...]
    b1 = b1_ref[...].astype(jnp.float32)
    b2 = b2_ref[...].astype(jnp.float32)
    b3 = b3_ref[...].astype(jnp.float32)

    bn = x_ref.shape[0]
    for b in range(bn):                      # static unroll over the batch block
        x = x_ref[b]                         # (Cin, t_hw), native dtype
        h = jnp.dot(w1, x, preferred_element_type=jnp.float32)
        h = _leaky_relu(h + b1)
        h = h.astype(w2.dtype)

        h = jnp.dot(w2, h, preferred_element_type=jnp.float32)
        h = _leaky_relu(h + b2)
        h = h.astype(w3.dtype)

        out = jnp.dot(w3, h, preferred_element_type=jnp.float32) + b3
        o_ref[b] = out.astype(o_ref.dtype)


def _vmem_capacity_bytes():
    try:
        return int(pltpu.get_tpu_info().vmem_capacity_bytes)
    except Exception:
        return 64 << 20  # conservative (v7x-class) fallback


def _vmem_budget_bytes(cap):
    """Generation-aware planning budget with headroom for Mosaic scratch."""
    if cap <= (64 << 20):                                     # v7x-class
        return max(24 << 20, min(40 << 20, cap - (20 << 20)))
    return max(40 << 20, min(104 << 20, cap - (24 << 20)))    # v5e / v6e


def _select_tiling(N, Cin, hidden, out_f, HW, x_itemsize, w_itemsize, budget):
    """Pick (batch_block, pixel_tile, per-step VMEM estimate) from the budget."""
    w_bytes = (Cin * hidden + hidden * hidden + hidden * out_f
               + 2 * hidden + out_f) * w_itemsize
    io_per_pix = (Cin + out_f) * x_itemsize                        # HBM bytes/pixel
    # Double-buffered in/out blocks + ~3 live f32 intermediates per pixel.
    vmem_per_pix = 2 * (Cin + out_f) * x_itemsize + 3 * hidden * 4

    headroom = 2
    avail = budget // headroom - 2 * w_bytes                       # weights dbl-buffered
    max_pix = max(256, avail // max(vmem_per_pix, 1))

    # Target >= ~1 MiB of HBM traffic per grid step (>= 8192 pixels for small
    # channel counts), bounded by the VMEM budget.
    target_pix = max((1 << 20) // max(io_per_pix, 1), 8192)
    target_pix = min(target_pix, max_pix)

    if HW >= target_pix:
        bn = 1
        grain = 512 if target_pix >= 2048 else 128
        t_hw = min(HW, max(128, (target_pix // grain) * grain))
    else:
        t_hw = HW                                                  # full extent -> lane-dense
        bn = min(N, max(1, target_pix // HW), max(1, max_pix // HW), _MAX_BN)

    def steps(bn_, t_):
        return pl.cdiv(N, bn_) * pl.cdiv(HW, t_)

    # Megacore / pipeline balance: prefer >= 4 steps by shrinking the batch
    # block; guarantee >= 2 steps (when possible) by splitting the pixel axis
    # into lane-dense (multiple-of-128) tiles.
    while bn > 1 and steps(bn, t_hw) < 4:
        bn = max(1, bn // 2)
    if steps(bn, t_hw) < 2 and HW > 128:
        half = _rup(pl.cdiv(HW, 2), 128)
        if half < HW:
            t_hw = half

    est = 2 * w_bytes + bn * t_hw * vmem_per_pix
    return bn, t_hw, est


def conv2d1x1_forward(x_nchw, params):
    """x_nchw: (N, C_in, H, W). Returns (N, C_out, H, W)."""
    w1, b1, w2, b2, w3, b3 = params          # w: (Cout, Cin), b: (Cout, 1)
    N, Cin, H, W = x_nchw.shape
    hidden = w1.shape[0]
    out_f = w3.shape[0]
    HW = H * W

    # (N, Cin, H, W) -> (N, Cin, HW): free row-major reshape, no HBM traffic.
    x_mat = x_nchw.reshape(N, Cin, HW)

    cap = _vmem_capacity_bytes()
    budget = _vmem_budget_bytes(cap)
    bn, t_hw, est = _select_tiling(N, Cin, hidden, out_f, HW,
                                   x_nchw.dtype.itemsize, w1.dtype.itemsize,
                                   budget)
    # Declared compiler limit: the planning budget, never below 2x the actual
    # per-step estimate (robustness for very large channel counts), never
    # above physical capacity minus headroom for Mosaic internal scratch.
    vmem_limit = int(min(max(budget, 2 * est), max(budget, cap - (8 << 20))))

    grid = (pl.cdiv(N, bn), pl.cdiv(HW, t_hw))
    full = lambda n, j: (0, 0)

    out_mat = pl.pallas_call(
        conv1x1_mlp_kernel,
        out_shape=jax.ShapeDtypeStruct((N, out_f, HW), x_nchw.dtype),
        grid_spec=pltpu.PrefetchScalarGridSpec(
            num_scalar_prefetch=0,
            grid=grid,
            in_specs=[
                pl.BlockSpec((bn, Cin, t_hw), lambda n, j: (n, 0, j)),
                pl.BlockSpec((hidden, Cin), full),
                pl.BlockSpec((hidden, 1), full),
                pl.BlockSpec((hidden, hidden), full),
                pl.BlockSpec((hidden, 1), full),
                pl.BlockSpec((out_f, hidden), full),
                pl.BlockSpec((out_f, 1), full),
            ],
            out_specs=pl.BlockSpec((bn, out_f, t_hw), lambda n, j: (n, 0, j)),
        ),
        compiler_params=pltpu.CompilerParams(
            dimension_semantics=("parallel", "parallel"),
            vmem_limit_bytes=vmem_limit),
    )(x_mat, w1, b1, w2, b2, w3, b3)

    # (N, out_f, HW) -> (N, out_f, H, W): free reshape.
    return out_mat.reshape(N, out_f, H, W)


def init_params(key, in_f, hidden_dim, out_f, dtype=jnp.float32):
    """Deterministic synthetic init (PyTorch-like uniform fan-in scaling).

    Weights stored as (Cout, Cin) -- the natural squeeze of PyTorch's
    (Cout, Cin, 1, 1) conv weight; biases as (Cout, 1).
    """
    ks = jax.random.split(key, 6)

    def uinit(k, shape, fan_in):
        bound = 1.0 / jnp.sqrt(fan_in)
        return jax.random.uniform(k, shape, dtype, minval=-bound, maxval=bound)

    w1 = uinit(ks[0], (hidden_dim, in_f), in_f)
    b1 = uinit(ks[1], (hidden_dim, 1), in_f)
    w2 = uinit(ks[2], (hidden_dim, hidden_dim), hidden_dim)
    b2 = uinit(ks[3], (hidden_dim, 1), hidden_dim)
    w3 = uinit(ks[4], (out_f, hidden_dim), hidden_dim)
    b3 = uinit(ks[5], (out_f, 1), hidden_dim)
    return (w1, b1, w2, b2, w3, b3)


def reference_forward(x_nchw, params):
    """Pure-JAX reference of the PyTorch module, for a correctness check."""
    w1, b1, w2, b2, w3, b3 = params

    def conv1x1(x, w, b):
        y = jnp.einsum('oc,nchw->nohw', w.astype(jnp.float32), x)
        return y + b.astype(jnp.float32).reshape(1, -1, 1, 1)

    x = x_nchw.astype(jnp.float32)
    h = _leaky_relu(conv1x1(x, w1, b1))
    h = _leaky_relu(conv1x1(h, w2, b2))
    o = conv1x1(h, w3, b3)
    return o.astype(x_nchw.dtype)


if __name__ == "__main__":
    key = jax.random.PRNGKey(0)
    k_x, k_p = jax.random.split(key)

    N, in_f, H, W = 2, 4, 16, 16
    hidden_dim, out_f = 32, 8

    x = jax.random.normal(k_x, (N, in_f, H, W), dtype=jnp.float32)
    params = init_params(k_p, in_f, hidden_dim, out_f)

    out = conv2d1x1_forward(x, params)
    out = jax.block_until_ready(out)

    ref = reference_forward(x, params)
    assert out.shape == (N, out_f, H, W)
    assert jnp.allclose(out, ref, atol=1e-5, rtol=1e-5)

    print("KERNEL_OK")
</pallas_src>

<mosaic_0001>
module attributes {stable_mosaic.version = 11 : i64} {
  func.func @conv1x1_mlp_kernel(%arg0: i32, %arg1: i32, %arg2: memref<1x4x256xf32, #tpu.memory_space<vmem>>, %arg3: memref<32x4xf32, #tpu.memory_space<vmem>>, %arg4: memref<32x1xf32, #tpu.memory_space<vmem>>, %arg5: memref<32x32xf32, #tpu.memory_space<vmem>>, %arg6: memref<32x1xf32, #tpu.memory_space<vmem>>, %arg7: memref<8x32xf32, #tpu.memory_space<vmem>>, %arg8: memref<8x1xf32, #tpu.memory_space<vmem>>, %arg9: memref<1x8x256xf32, #tpu.memory_space<vmem>>) attributes {dimension_semantics = [#tpu.dimension_semantics<parallel>, #tpu.dimension_semantics<parallel>], iteration_bounds = array<i64: 2, 1>, scalar_prefetch = 0 : i64, scratch_operands = 0 : i64, tpu.core_type = #tpu.core_type<tc>, window_params = [{transform_indices = @transform_0, window_bounds = array<i64: 1, 4, 256>}, {pipeline_mode = #tpu.pipeline_mode<synchronous>, transform_indices = @transform_1, window_bounds = array<i64: 32, 4>}, {pipeline_mode = #tpu.pipeline_mode<synchronous>, transform_indices = @transform_2, window_bounds = array<i64: 32, 1>}, {pipeline_mode = #tpu.pipeline_mode<synchronous>, transform_indices = @transform_3, window_bounds = array<i64: 32, 32>}, {pipeline_mode = #tpu.pipeline_mode<synchronous>, transform_indices = @transform_4, window_bounds = array<i64: 32, 1>}, {pipeline_mode = #tpu.pipeline_mode<synchronous>, transform_indices = @transform_5, window_bounds = array<i64: 8, 32>}, {pipeline_mode = #tpu.pipeline_mode<synchronous>, transform_indices = @transform_6, window_bounds = array<i64: 8, 1>}, {transform_indices = @transform_7, window_bounds = array<i64: 1, 8, 256>}]} {
    %c0 = arith.constant 0 : index
    %c0_0 = arith.constant 0 : index
    %0 = vector.load %arg3[%c0, %c0_0] : memref<32x4xf32, #tpu.memory_space<vmem>>, vector<32x4xf32>
    %c0_1 = arith.constant 0 : index
    %c0_2 = arith.constant 0 : index
    %1 = vector.load %arg5[%c0_1, %c0_2] : memref<32x32xf32, #tpu.memory_space<vmem>>, vector<32x32xf32>
    %c0_3 = arith.constant 0 : index
    %c0_4 = arith.constant 0 : index
    %2 = vector.load %arg7[%c0_3, %c0_4] : memref<8x32xf32, #tpu.memory_space<vmem>>, vector<8x32xf32>
    %c0_5 = arith.constant 0 : index
    %c0_6 = arith.constant 0 : index
    %3 = vector.load %arg4[%c0_5, %c0_6] : memref<32x1xf32, #tpu.memory_space<vmem>>, vector<32x1xf32>
    %c0_7 = arith.constant 0 : index
    %c0_8 = arith.constant 0 : index
    %4 = vector.load %arg6[%c0_7, %c0_8] : memref<32x1xf32, #tpu.memory_space<vmem>>, vector<32x1xf32>
    %c0_9 = arith.constant 0 : index
    %c0_10 = arith.constant 0 : index
    %5 = vector.load %arg8[%c0_9, %c0_10] : memref<8x1xf32, #tpu.memory_space<vmem>>, vector<8x1xf32>
    %c0_11 = arith.constant 0 : index
    %c0_12 = arith.constant 0 : index
    %c0_13 = arith.constant 0 : index
    %6 = vector.load %arg2[%c0_11, %c0_12, %c0_13] : memref<1x4x256xf32, #tpu.memory_space<vmem>>, vector<1x4x256xf32>
    %7 = vector.shape_cast %6 : vector<1x4x256xf32> to vector<4x256xf32>
    %cst = arith.constant dense<0.000000e+00> : vector<32x256xf32>
    %8 = tpu.matmul %0, %7, %cst {dimension_numbers = #tpu.dot_dimension_numbers<[1], [0], [0], [1], [0, 0, 1, 1], [], []>} : vector<32x4xf32>, vector<4x256xf32>, vector<32x256xf32> -> vector<32x256xf32>
    %9 = vector.broadcast %3 : vector<32x1xf32> to vector<32x256xf32>
    %10 = arith.addf %8, %9 : vector<32x256xf32>
    %cst_14 = arith.constant 0.00999999977 : f32
    %11 = vector.broadcast %cst_14 : f32 to vector<32x256xf32>
    %12 = arith.mulf %11, %10 : vector<32x256xf32>
    %13 = arith.maximumf %10, %12 : vector<32x256xf32>
    %cst_15 = arith.constant dense<0.000000e+00> : vector<32x256xf32>
    %14 = tpu.matmul %1, %13, %cst_15 {dimension_numbers = #tpu.dot_dimension_numbers<[1], [0], [0], [1], [0, 0, 1, 1], [], []>} : vector<32x32xf32>, vector<32x256xf32>, vector<32x256xf32> -> vector<32x256xf32>
    %15 = vector.broadcast %4 : vector<32x1xf32> to vector<32x256xf32>
    %16 = arith.addf %14, %15 : vector<32x256xf32>
    %cst_16 = arith.constant 0.00999999977 : f32
    %17 = vector.broadcast %cst_16 : f32 to vector<32x256xf32>
    %18 = arith.mulf %17, %16 : vector<32x256xf32>
    %19 = arith.maximumf %16, %18 : vector<32x256xf32>
    %cst_17 = arith.constant dense<0.000000e+00> : vector<8x256xf32>
    %20 = tpu.matmul %2, %19, %cst_17 {dimension_numbers = #tpu.dot_dimension_numbers<[1], [0], [0], [1], [0, 0, 1, 1], [], []>} : vector<8x32xf32>, vector<32x256xf32>, vector<8x256xf32> -> vector<8x256xf32>
    %21 = vector.broadcast %5 : vector<8x1xf32> to vector<8x256xf32>
    %22 = arith.addf %20, %21 : vector<8x256xf32>
    %c0_18 = arith.constant 0 : index
    %c0_19 = arith.constant 0 : index
    %c0_20 = arith.constant 0 : index
    %23 = vector.load %arg9[%c0_18, %c0_19, %c0_20] : memref<1x8x256xf32, #tpu.memory_space<vmem>>, vector<1x8x256xf32>
    %24 = vector.shape_cast %23 : vector<1x8x256xf32> to vector<8x256xf32>
    %25 = vector.shape_cast %22 : vector<8x256xf32> to vector<1x8x256xf32>
    tpu.vector_store %arg9[%c0_18, %c0_19, %c0_20], %25 {strides = array<i32>} : memref<1x8x256xf32, #tpu.memory_space<vmem>>, vector<1x8x256xf32>,
    return
  }
  func.func @transform_0(%arg0: i32, %arg1: i32) -> (i32, i32, i32) {
    %c0_i32 = arith.constant 0 : i32
    %c0_i32_0 = arith.constant 0 : i32
    return %arg0, %c0_i32, %arg1 : i32, i32, i32
  }
  func.func @transform_1(%arg0: i32, %arg1: i32) -> (i32, i32) {
    %c0_i32 = arith.constant 0 : i32
    %c0_i32_0 = arith.constant 0 : i32
    %c0_i32_1 = arith.constant 0 : i32
    return %c0_i32, %c0_i32_0 : i32, i32
  }
  func.func @transform_2(%arg0: i32, %arg1: i32) -> (i32, i32) {
    %c0_i32 = arith.constant 0 : i32
    %c0_i32_0 = arith.constant 0 : i32
    %c0_i32_1 = arith.constant 0 : i32
    return %c0_i32, %c0_i32_0 : i32, i32
  }
  func.func @transform_3(%arg0: i32, %arg1: i32) -> (i32, i32) {
    %c0_i32 = arith.constant 0 : i32
    %c0_i32_0 = arith.constant 0 : i32
    %c0_i32_1 = arith.constant 0 : i32
    return %c0_i32, %c0_i32_0 : i32, i32
  }
  func.func @transform_4(%arg0: i32, %arg1: i32) -> (i32, i32) {
    %c0_i32 = arith.constant 0 : i32
    %c0_i32_0 = arith.constant 0 : i32
    %c0_i32_1 = arith.constant 0 : i32
    return %c0_i32, %c0_i32_0 : i32, i32
  }
  func.func @transform_5(%arg0: i32, %arg1: i32) -> (i32, i32) {
    %c0_i32 = arith.constant 0 : i32
    %c0_i32_0 = arith.constant 0 : i32
    %c0_i32_1 = arith.constant 0 : i32
    return %c0_i32, %c0_i32_0 : i32, i32
  }
  func.func @transform_6(%arg0: i32, %arg1: i32) -> (i32, i32) {
    %c0_i32 = arith.constant 0 : i32
    %c0_i32_0 = arith.constant 0 : i32
    %c0_i32_1 = arith.constant 0 : i32
    return %c0_i32, %c0_i32_0 : i32, i32
  }
  func.func @transform_7(%arg0: i32, %arg1: i32) -> (i32, i32, i32) {
    %c0_i32 = arith.constant 0 : i32
    %c0_i32_0 = arith.constant 0 : i32
    return %arg0, %c0_i32, %arg1 : i32, i32, i32
  }
}

</mosaic_0001>

<bundles_post_ra>
// kernel: tpu_custom_call.1
= control target key start
LH: loop header
LB: loop body
LE: loop exit
PB: predicated region body
PF: predicated region fallthrough
CT: control target
= control target key end

     0   :  { %12 = vsyncpa [#allocation3], 0  ;;  %s1162_s0 = inlined_call_operand.vmem [shape: f32[2,4,256], index: 0, kind: input, shape index: {}]   ;;  %s1163_s1 = inlined_call_operand.vmem [shape: f32[32,4], index: 1, kind: input, shape index: {}]   ;;  %s1164_s2 = inlined_call_operand.vmem [shape: f32[32,1], index: 2, kind: input, shape index: {}]   ;;  %s1165_s3 = inlined_call_operand.vmem [shape: f32[32,32], index: 3, kind: input, shape index: {}]   ;;  %s1166_s4 = inlined_call_operand.vmem [shape: f32[32,1], index: 4, kind: input, shape index: {}]   ;;  %s1167_s5 = inlined_call_operand.vmem [shape: f32[8,32], index: 5, kind: input, shape index: {}]   ;;  %s1168_s6 = inlined_call_operand.vmem [shape: f32[8,1], index: 6, kind: input, shape index: {}]   ;;  %s1169_s7 = inlined_call_operand.hbm [shape: f32[2,8,256], index: 7, kind: output, shape index: {}]  }
   0x1   :  { %14 = vsyncpa [#allocation3 + $0x1], 0  ;;  %s991_s24 = smov 0   ;;  %s993_s25 = smov 0  }
   0x2   :  { %s995_s26 = smov 0   ;;  %s997_s27 = smov 0  }
   0x3   :  { %s999_s28 = smov 0   ;;  %s1001_s29 = smov 0  }
   0x4 LB: > { %s784_s30 = sadd.s32 4294967295, %s946_s29   ;;  %s785_s8 = sadd.s32 4294967294, %s946_s29   ;;  %s946_s29 = sphi %s1001_s29, %s20_s29   ;;  %s942_s28 = sphi %s999_s28, %s1176_s28   ;;  %s938_s27 = sphi %s997_s27, %s1175_s27   ;;  %s934_s26 = sphi %s995_s26, %s1174_s26   ;;  %s930_s25 = sphi %s993_s25, %s1173_s25   ;;  %s926_s24 = sphi %s991_s24, %s1172_s24  }
   0x5   : > { %s32_s9 = sadd.s32 1, %s942_s28  ;;  %s195_s10 = sadd.s32 1, %s934_s26 }
   0x6   : > { %p34_p0 = scmp.ge.s32.totalorder %s32_s9, 2  ;;  %p205_p1 = scmp.ne.s32.totalorder %s934_s26, %s930_s25 }
   0x7   : > { %p206_p2 = scmp.eq.s32.totalorder %s784_s30, 1  ;;  %p211_p3 = scmp.ne.s32.totalorder %s930_s25, %s926_s24 }
   0x8   : > { %s1178_s9 = smov (%p34_p0, %s32_s9), 0  ;;  %p212_p5 = scmp.eq.s32.totalorder %s785_s8, 1 }
   0x9   : > { %p1031_p4 = por %p206_p2, %p205_p1  ;;  %s190_s12 = ssub.s32 %s942_s28, %s1178_s9 }
   0xa   : > { %p788_p6 = scmp.ge.s32.totalorder %s946_s29, 1  ;;  %p193_p7 = scmp.eq.s32.totalorder %s190_s12, 0 }
   0xb   : > { %p1038_p8 = por %p212_p5, %p211_p3  ;;  %p261_p9 = scmp.lt.s32.totalorder %s946_s29, 3 }
   0xc   : > { %s1044_s14 = scalar_select %p193_p7, %s934_s26, %s195_s10  }
   0xd   : > { %p262_p10 = pnand %p788_p6, %p261_p9 }
   0xe   : > { %p298_p11 = scmp.lt.s32.totalorder (!%p262_p10), %s938_s27, 1  ;;  %s809_s19 = sshll.u32 (!%p262_p10), %s938_s27, 8 }
   0xf   : > { %265 = sbr.rel (%p262_p10) target bundleno = 682 (0x2aa), region = 48  ;;  %s706_s30 = scalar_lea.hbm (!%p262_p10), %s1169_s7, %s809_s19 }
  0x14   : > { %v948_v0 = vmov 0.0   ;;  %v320_v1 = vld [vmem:[%s1164_s2 + $0x18] sm:$0xff]  ;;  %s299_s17 = scalar_select %p298_p11, %s938_s27, 1  ;;  %v949_v2 = vmov 0   ;;  %v318_v3 = vld [vmem:[%s1164_s2 + $0x8] sm:$0xff]  ;;  %v319_v4 = vld [vmem:[%s1164_s2 + $0x10] sm:$0xff] }
  0x15   : > { %431 = vmatprep.mubr.f32.mxu0 %v948_v0  ;;  %569 = vmatprep.mubr.f32.mxu1 %v948_v0  ;;  %v317_v5 = vld [vmem:[%s1164_s2] sm:$0xff]  ;;  %vm362_vm0 = vcmask 1043456   ;;  %vm349_vm1 = vcmask 31744   ;;  %v324_v9 = vld [vmem:[%s1166_s4 + $0x18] sm:$0xff]  ;;  %v323_v10 = vld [vmem:[%s1166_s4 + $0x10] sm:$0xff]  ;;  %vm492_vm2 = vcmask 261120  }
  0x16   : > { %868 = vset.pattern.permute.xlu1 %v949_v2  ;;  %867 = vset.pattern.permute.xlu0 %v949_v2  ;;  %s808_s20 = sshll.u32 %s299_s17, 3  ;;  %v308_v8 = vld [vmem:[%s1163_s1] sm:$0xff]  ;;  %v309_v11 = vld [vmem:[%s1163_s1 + $0x8] sm:$0xff]  ;;  %v310_v14 = vld [vmem:[%s1163_s1 + $0x10] sm:$0xff]  ;;  %s294_s17 = sand.u32 1, %s930_s25  }
  0x17   : > { %344 = vperm.xlu0 %867, %v320_v1   ;;  %334 = vperm.xlu1 %868, %v318_v3   ;;  %s305_s12 = scalar_lea.vmem %s1162_s0, %s808_s20  ;;  %v322_v12 = vld [vmem:[%s1166_s4 + $0x8] sm:$0xff]  ;;  %v321_v13 = vld [vmem:[%s1166_s4] sm:$0xff]  ;;  %v311_v16 = vld [vmem:[%s1163_s1 + $0x18] sm:$0xff]  ;;  %s789_s18 = sshll.u32 %s294_s17, 4 }
  0x18   : > { %v326_v6 = vld [vmem:[%s305_s12] sm:$0xff]  ;;  %v313_v54 = vld [vmem:[%s1165_s3 + $0x8] sm:$0xff]  ;;  %v314_v55 = vld [vmem:[%s1165_s3 + $0x10] sm:$0xff]  ;;  %s296_s21 = scalar_lea.vmem [#allocation2], %s789_s18  ;;  %s692_s8 = scalar_lea.sflag [#allocation3], %s294_s17 }
  0x19   : > { %v348_v7 = vcombine.high %v326_v6, %v326_v6  ;;  %v325_v15 = vld [vmem:[%s1168_s6] sm:$0xff]  ;;  %v315_v56 = vld [vmem:[%s1165_s3 + $0x18] sm:$0xff]  ;;  %s708_s20 = sshll.u32 %s296_s21, 4  ;;  %s950_s12 = smov [#allocation2]   ;;  %s709_s20 = int_to_ptr.vmem [resolvable:$true] %s708_s20 }
  0x1a   : > { %v312_v53 = vld [vmem:[%s1165_s3] sm:$0xff]  ;;  %s870_s10 = scalar_lea.vmem %s709_s20, 256  ;;  %s874_s27 = sshll.u32 %s950_s12, 4  ;;  %s875_s27 = int_to_ptr.vmem [resolvable:$false] %s874_s27 }
  0x1b   : > { %339 = vperm.xlu0 %867, %v319_v4   ;;  %329 = vperm.xlu1 %868, %v317_v5   ;;  %p871_p12 = scmp.ne.s32.totalorder %s709_s20, %s870_s10  ;;  %s876_s15 = scalar_lea.vmem %s875_s27, 512 }
  0x1c   : > { %792 = vmatprep.subr.msk.mxu0 %vm362_vm0, %v348_v7  ;;  %p877_p1 = scmp.lt.s32.totalorder %s709_s20, %s875_s27  ;;  %p878_p2 = scmp.lt.s32.totalorder %s876_s15, %s870_s10 }
  0x1d   : > { %793 = vmatpush1.msk.msra.mxu0 %vm362_vm0, %v326_v6  ;;  %p872_p13 = pnand %p871_p12, %p1031_p4 }
  0x1e   : > { %794 = vmatmul.mubr.msk.f32.vlgmr.msra.gmra.mxu0 %vm349_vm1, %v308_v8  ;;  %p879_p3 = por %p878_p2, %p877_p1 }
  0x1f   : > { %489 = vperm.xlu0 %867, %v324_v9   ;;  %437 = vmatprep.mubr.f32.mxu0 %v948_v0  ;;  %p873_p0 = pneg %p872_p13 }
  0x20   : > { %484 = vperm.xlu1 %868, %v323_v10  }
  0x21   : > { %p880_p5 = pnand %p879_p3, %p873_p0 }
  0x22   : > { %795 = vmatmul.mubr.msk.f32.gmra.mxu0 %vm349_vm1, %v309_v11 }
  0x23   : > { %479 = vperm.xlu0 %867, %v322_v12   ;;  %443 = vmatprep.mubr.f32.mxu0 %v948_v0 }
  0x24   : > { %474 = vperm.xlu1 %868, %v321_v13  }
  0x26   : > { %796 = vmatmul.mubr.msk.f32.gmra.mxu0 %vm349_vm1, %v310_v14 }
  0x27   : > { %612 = vperm.xlu0 %867, %v325_v15   ;;  %449 = vmatprep.mubr.f32.mxu0 %v948_v0 }
  0x2a   : > { %797 = vmatmul.mubr.msk.f32.gmra.mxu0 %vm349_vm1, %v311_v16 }
  0x2b   : > { %682 = vmatprep.mubr.f32.mxu0 %v948_v0 }
  0x92   : > { %v345_v20 = vpop.permute.xlu0 %344  ;;  %v335_v23 = vpop.permute.xlu1 %334 }
  0x96   : > { %v340_v25 = vpop.permute.xlu0 %339  ;;  %v330_v31 = vpop.permute.xlu1 %329 }
  0x9a   : > { %v490_v61 = vpop.permute.xlu0 %489 }
  0x9b   : > { %v485_v63 = vpop.permute.xlu1 %484 }
  0x9e   : > { %v480_v5 = vpop.permute.xlu0 %479 }
  0x9f   : > { %v475_v9 = vpop.permute.xlu1 %474 }
  0xde   : > { %v433_v17 = vpop.f32.mrf.mxu0 }
  0xdf   : > { %v434_v39 = vadd.f32 %v433_v17, %v330_v31 }
  0xe0   : > { %v435_v18 = vpop.f32.mrf.mxu0 }
  0xe1   : > { %v436_v36 = vadd.f32 %v435_v18, %v330_v31  ;;  %v456_v47 = vmul.f32 0.01, %v434_v39 }
  0xe2   : > { %v439_v19 = vpop.f32.mrf.mxu0 }
  0xe3   : > { %v440_v34 = vadd.f32 %v439_v19, %v335_v23  ;;  %v457_v45 = vmul.f32 0.01, %v436_v36  ;;  %v464_v52 = vmax.f32 %v434_v39, %v456_v47 }
  0xe4   : > { %v441_v21 = vpop.f32.mrf.mxu0 }
  0xe5   : > { %v442_v32 = vadd.f32 %v441_v21, %v335_v23  ;;  %v458_v43 = vmul.f32 0.01, %v440_v34  ;;  %v465_v51 = vmax.f32 %v436_v36, %v457_v45 }
  0xe6   : > { %v445_v22 = vpop.f32.mrf.mxu0 }
  0xe7   : > { %v446_v29 = vadd.f32 %v445_v22, %v340_v25  ;;  %v459_v41 = vmul.f32 0.01, %v442_v32  ;;  %v466_v50 = vmax.f32 %v440_v34, %v458_v43 }
  0xe8   : > { %v447_v24 = vpop.f32.mrf.mxu0 }
  0xe9   : > { %v448_v27 = vadd.f32 %v447_v24, %v340_v25  ;;  %v460_v40 = vmul.f32 0.01, %v446_v29  ;;  %v467_v49 = vmax.f32 %v442_v32, %v459_v41 }
  0xea   : > { %v451_v26 = vpop.f32.mrf.mxu0 }
  0xeb   : > { %v452_v28 = vadd.f32 %v451_v26, %v345_v20  ;;  %v461_v37 = vmul.f32 0.01, %v448_v27  ;;  %v468_v48 = vmax.f32 %v446_v29, %v460_v40  ;;  %v316_v29 = vld [vmem:[%s1167_s5] sm:$0xff] }
  0xec   : > { %v453_v30 = vpop.f32.mrf.mxu0 }
  0xed   : > { %v454_v33 = vadd.f32 %v453_v30, %v345_v20  ;;  %v462_v35 = vmul.f32 0.01, %v452_v28  ;;  %v469_v46 = vmax.f32 %v448_v27, %v461_v37  ;;  %v613_v30 = vpop.permute.xlu0 %612 }
  0xef   : > { %v463_v38 = vmul.f32 0.01, %v454_v33  ;;  %v470_v44 = vmax.f32 %v452_v28, %v462_v35 }
  0xf1   : > { %v471_v42 = vmax.f32 %v454_v33, %v463_v38 }
  0xf3   : > { %529 = vmatprep.subr.mxu1 %v471_v42 }
  0xf4   : > { %530 = vmatpush1.msra.mxu1 %v470_v44 }
  0xf5   : > { %531 = vmatprep.subr.mxu1 %v469_v46 }
  0xf6   : > { %532 = vmatpush1.msra.mxu1 %v468_v48 }
  0xf7   : > { %533 = vmatprep.subr.mxu1 %v467_v49 }
  0xf8   : > { %534 = vmatpush1.msra.mxu1 %v466_v50 }
  0xf9   : > { %535 = vmatprep.subr.mxu1 %v465_v51 }
  0xfa   : > { %536 = vmatpush1.msra.mxu1 %v464_v52 }
  0xfb   : > { %798 = vmatmul.mubr.msk.f32.vlgmr.msra.gmra.mxu1 %vm492_vm2, %v312_v53 }
  0xfc   : > { %575 = vmatprep.mubr.f32.mxu1 %v948_v0 }
  0xff   : > { %799 = vmatmul.mubr.msk.f32.gmra.mxu1 %vm492_vm2, %v313_v54 }
 0x100   : > { %581 = vmatprep.mubr.f32.mxu1 %v948_v0 }
 0x103   : > { %800 = vmatmul.mubr.msk.f32.gmra.mxu1 %vm492_vm2, %v314_v55 }
 0x104   : > { %587 = vmatprep.mubr.f32.mxu1 %v948_v0 }
 0x107   : > { %801 = vmatmul.mubr.msk.f32.gmra.mxu1 %vm492_vm2, %v315_v56 }
 0x1bb   : > { %v571_v57 = vpop.f32.mrf.mxu1 }
 0x1bc   : > { %v572_v15 = vadd.f32 %v571_v57, %v475_v9 }
 0x1bd   : > { %v573_v58 = vpop.f32.mrf.mxu1 }
 0x1be   : > { %v574_v12 = vadd.f32 %v573_v58, %v475_v9  ;;  %v594_v23 = vmul.f32 0.01, %v572_v15 }
 0x1bf   : > { %v577_v59 = vpop.f32.mrf.mxu1 }
 0x1c0   : > { %v578_v10 = vadd.f32 %v577_v59, %v480_v5  ;;  %v595_v21 = vmul.f32 0.01, %v574_v12  ;;  %v602_v28 = vmax.f32 %v572_v15, %v594_v23 }
 0x1c1   : > { %v579_v60 = vpop.f32.mrf.mxu1 }
 0x1c2   : > { %v580_v7 = vadd.f32 %v579_v60, %v480_v5  ;;  %v596_v19 = vmul.f32 0.01, %v578_v10  ;;  %v603_v27 = vmax.f32 %v574_v12, %v595_v21 }
 0x1c3   : > { %v583_v62 = vpop.f32.mrf.mxu1 }
 0x1c4   : > { %v584_v6 = vadd.f32 %v583_v62, %v485_v63  ;;  %v597_v17 = vmul.f32 0.01, %v580_v7  ;;  %v604_v26 = vmax.f32 %v578_v10, %v596_v19 }
 0x1c5   : > { %v585_v1 = vpop.f32.mrf.mxu1 }
 0x1c6   : > { %v586_v3 = vadd.f32 %v585_v1, %v485_v63  ;;  %v598_v16 = vmul.f32 0.01, %v584_v6  ;;  %v605_v25 = vmax.f32 %v580_v7, %v597_v17 }
 0x1c7   : > { %v589_v2 = vpop.f32.mrf.mxu1 }
 0x1c8   : > { %v590_v4 = vadd.f32 %v589_v2, %v490_v61  ;;  %v599_v13 = vmul.f32 0.01, %v586_v3  ;;  %v606_v24 = vmax.f32 %v584_v6, %v598_v16 }
 0x1c9   : > { %v591_v0 = vpop.f32.mrf.mxu1 }
 0x1ca   : > { %v592_v8 = vadd.f32 %v591_v0, %v490_v61  ;;  %v600_v11 = vmul.f32 0.01, %v590_v4  ;;  %v607_v22 = vmax.f32 %v586_v3, %v599_v13 }
 0x1cc   : > { %v601_v14 = vmul.f32 0.01, %v592_v8  ;;  %v608_v20 = vmax.f32 %v590_v4, %v600_v11 }
 0x1ce   : > { %v609_v18 = vmax.f32 %v592_v8, %v601_v14 }
 0x1d0   : > { %642 = vmatprep.subr.mxu0 %v609_v18 }
 0x1d1   : > { %643 = vmatpush1.msra.mxu0 %v608_v20 }
 0x1d2   : > { %644 = vmatprep.subr.mxu0 %v607_v22 }
 0x1d3   : > { %645 = vmatpush1.msra.mxu0 %v606_v24 }
 0x1d4   : > { %646 = vmatprep.subr.mxu0 %v605_v25 }
 0x1d5   : > { %647 = vmatpush1.msra.mxu0 %v604_v26 }
 0x1d6   : > { %648 = vmatprep.subr.mxu0 %v603_v27 }
 0x1d7   : > { %649 = vmatpush1.msra.mxu0 %v602_v28 }
 0x1d8   : > { %802 = vmatmul.mubr.msk.f32.vlgmr.msra.gmra.mxu0 %vm492_vm2, %v316_v29 }
 0x298   : > { %v684_v31 = vpop.f32.mrf.mxu0 }
 0x299   : > { %v685_v32 = vadd.f32 %v684_v31, %v613_v30 }
 0x29a   : > { %v686_v33 = vpop.f32.mrf.mxu0 }
 0x29b   : > { %689 = vst [vmem:[%s296_s21] sm:$0xff] %v685_v32  ;;  %v687_v34 = vadd.f32 %v686_v33, %v613_v30 }
 0x29d   : > { %690 = vst [vmem:[%s296_s21 + $0x8] sm:$0xff] %v687_v34 }
 0x29e   : > { %883 = shalt.err (!%p880_p5)
}
 0x29f   : > { %s884_s16 = scalar_lea.hbm %s706_s30, 256  ;;  %s888_s19 = scalar_lea.hbm %s1169_s7, 512 }
 0x2a0   : > { %p885_p6 = scmp.ne.s32.totalorder %s706_s30, %s884_s16  ;;  %p889_p10 = scmp.lt.s32.totalorder %s706_s30, %s1169_s7 }
 0x2a1   : > { %p890_p11 = scmp.lt.s32.totalorder %s888_s19, %s884_s16 }
 0x2a2   : > { %p886_p7 = pnand %p885_p6, %p1031_p4 }
 0x2a3   : > { %p891_p12 = por %p890_p11, %p889_p10 }
 0x2a4   : > { %p887_p9 = pneg %p886_p7 }
 0x2a6   : > { %p892_p13 = pnand %p891_p12, %p887_p9 }
 0x2a8   : > { %895 = shalt.err (!%p892_p13)
}
 0x2a9   : > { %810 = dma.vmem_to_hbm [thread:$0]  (%p1031_p4), %s709_s20, 256, %s706_s30, %s692_s8  }
 0x2aa PF: > { %p816_p0 = scmp.ge.s32.totalorder %s946_s29, 2  ;;  %s720_s23 = sand.u32 1, %s926_s24  }
 0x2ab   : > { %s721_s10 = scalar_lea.sflag [#allocation3], %s720_s23 }
 0x2ac   : > { %p813_p1 = pnand %p816_p0, %p1038_p8 }
 0x2ae   : > { %p814_p2 = pneg %p813_p1 }
 0x2b0   : > { %921 = dma.done.wait (%p814_p2), %s721_s10, 256  }
 0x2b1   : > { %923 = vsyncadd (%p814_p2), %s721_s10, 4294967040  ;;  %s20_s29 = sadd.s32 1, %s946_s29   ;;  %s1172_s24 = smov %s930_s25 }
 0x2b2   : > { %p17_p3 = scmp.ge.s32.totalorder %s20_s29, 4   ;;  %s1173_s25 = smov %s934_s26 }
 0x2b3   : > { %s1174_s26 = smov %s1044_s14  ;;  %s1175_s27 = smov %s942_s28 }
 0x2b4   : > { %s1176_s28 = smov %s1178_s9  ;;  %19 = sbr.rel (!%p17_p3) target bundleno = 4 (0x4), region = 83 }
 0x2b9   :  { %726 = vsyncpa [#allocation3], 1 }
 0x2ba   :  { %728 = vsyncpa [#allocation3 + $0x1], 1 }

</bundles_post_ra>
